<compile_context>
chip_gen: v5e
topology: v5e:2x2
jax: 0.10.0
libtpu: 0.0.40
codegen_flags: <defaults>
</compile_context>

<pallas_src>
import functools

import jax
import jax.numpy as jnp
from jax.experimental import pallas as pl
from jax.experimental.pallas import tpu as pltpu

_LANE = 128  # last-dim (lane) granularity used for the internal hidden dims


def _round_up(x: int, m: int) -> int:
    return ((x + m - 1) // m) * m


def _mlp_kernel(*refs, num_layers: int):
    """refs = (x_ref, w0_ref, b0_ref, w1_ref, b1_ref, ..., o_ref).

    Whole MLP in one kernel body: intermediate activations never leave
    VMEM/vregs.  Matmul operands are bf16, accumulation / bias / tanh are f32.
    """
    x_ref = refs[0]
    o_ref = refs[-1]
    h = x_ref[...].astype(jnp.float32)
    for i in range(num_layers):
        w_ref = refs[1 + 2 * i]
        b_ref = refs[2 + 2 * i]
        acc = jnp.dot(
            h.astype(w_ref.dtype),          # bf16 LHS for the MXU
            w_ref[...],                     # bf16 weights
            preferred_element_type=jnp.float32,
        )
        acc = acc + b_ref[...].astype(jnp.float32)
        if i < num_layers - 1:              # Tanh between all layers but the last
            acc = jnp.tanh(acc)
        h = acc
    o_ref[...] = h.astype(o_ref.dtype)


def init_mlp_params(key, sizes, bias=True):
    """Deterministic init mirroring nn.Linear (uniform +-1/sqrt(fan_in)), f32."""
    params = []
    for i in range(len(sizes) - 1):
        fan_in, fan_out = sizes[i], sizes[i + 1]
        key, kw, kb = jax.random.split(key, 3)
        bound = 1.0 / jnp.sqrt(fan_in)
        # Stored already transposed relative to PyTorch: [in, out].
        w = jax.random.uniform(kw, (fan_in, fan_out), jnp.float32, -bound, bound)
        if bias:
            b = jax.random.uniform(kb, (1, fan_out), jnp.float32, -bound, bound)
        else:
            b = jnp.zeros((1, fan_out), jnp.float32)
        params.append((w, b))
    return params


def prepare_kernel_params(params):
    """One-time prep: zero-pad internal hidden dims to 128 and cast W to bf16.

    Only the *hidden* feature dims are padded: the first layer keeps its true
    input width (so x needs no per-call pad) and the last layer keeps its true
    output width (so the kernel output needs no slice).  Zero padding is
    exact: padded hidden columns get zero weight + zero bias (tanh(0)=0) and
    feed zero weight rows of the next layer.
    """
    n = len(params)
    prepared = []
    for i, (w, b) in enumerate(params):
        kin, kout = w.shape
        kin_p = kin if i == 0 else _round_up(kin, _LANE)
        kout_p = kout if i == n - 1 else _round_up(kout, _LANE)
        w_p = jnp.pad(w, ((0, kin_p - kin), (0, kout_p - kout))).astype(jnp.bfloat16)
        b_p = jnp.pad(b, ((0, 0), (0, kout_p - kout)))  # bias stays f32
        prepared.append((w_p, b_p))
    return prepared


def mlp_forward(x, kernel_params):
    """Fused MLP forward: one grid-less pallas_call for the whole stack."""
    num_layers = len(kernel_params)
    M, K0 = x.shape
    assert K0 == kernel_params[0][0].shape[0], "x features must match layer 0 fan_in"
    n_out = kernel_params[-1][0].shape[1]

    vmem_spec = pl.BlockSpec(memory_space=pltpu.MemorySpace.VMEM)

    flat_args = [x]
    in_specs = [vmem_spec]
    flops = 0
    transcendentals = 0
    total_bytes = x.size * x.dtype.itemsize
    for li, (w, b) in enumerate(kernel_params):
        kin, kout = w.shape
        flat_args += [w, b]
        in_specs += [vmem_spec, vmem_spec]
        flops += 2 * M * kin * kout
        if li < num_layers - 1:
            transcendentals += M * kout
        total_bytes += w.size * w.dtype.itemsize + b.size * b.dtype.itemsize
    total_bytes += M * n_out * x.dtype.itemsize

    # Explicit VMEM budget: everything is resident once (no double-buffering
    # since there is no grid); cap at 32 MiB so it is safe on v5e/v6e/v7x.
    vmem_limit = min(32 << 20, max(4 << 20, 8 * total_bytes))

    out = pl.pallas_call(
        functools.partial(_mlp_kernel, num_layers=num_layers),
        out_shape=jax.ShapeDtypeStruct((M, n_out), x.dtype),
        in_specs=in_specs,
        out_specs=vmem_spec,
        compiler_params=pltpu.CompilerParams(vmem_limit_bytes=vmem_limit),
        cost_estimate=pl.CostEstimate(
            flops=flops,
            transcendentals=transcendentals,
            bytes_accessed=total_bytes,
        ),
    )(*flat_args)
    return out


def mlp_reference(x, params):
    n = len(params)
    for i, (w, b) in enumerate(params):
        x = x @ w + b
        if i < n - 1:
            x = jnp.tanh(x)
    return x


if __name__ == "__main__":
    key = jax.random.PRNGKey(0)
    sizes = (32, 64, 48, 16)   # MLP(sizes): 3 Linear layers, Tanh between them
    batch = 8                  # NOTE: throughput scales with batch up to the
                               # MXU height (128 on v5e, 256 on v6e/v7x).

    key, kx, kp = jax.random.split(key, 3)
    x = jax.random.normal(kx, (batch, sizes[0]), jnp.float32)
    params = init_mlp_params(kp, sizes, bias=True)          # f32 reference params
    kernel_params = prepare_kernel_params(params)           # pad+cast once, reuse

    out = mlp_forward(x, kernel_params)
    out = jax.block_until_ready(out)

    ref = mlp_reference(x, params)
    assert out.shape == (batch, sizes[-1])
    max_err = float(jnp.max(jnp.abs(out - ref)))
    # bf16 matmul operands with f32 accumulation: loosened tolerance.
    assert jnp.allclose(out, ref, atol=2e-2, rtol=2e-2), f"max abs err {max_err}"

    print("KERNEL_OK")
</pallas_src>

<mosaic_0001>
module attributes {stable_mosaic.version = 11 : i64} {
  func.func @_mlp_kernel(%arg0: memref<8x32xf32, #tpu.memory_space<vmem>>, %arg1: memref<32x128xbf16, #tpu.memory_space<vmem>>, %arg2: memref<1x128xf32, #tpu.memory_space<vmem>>, %arg3: memref<128x128xbf16, #tpu.memory_space<vmem>>, %arg4: memref<1x128xf32, #tpu.memory_space<vmem>>, %arg5: memref<128x16xbf16, #tpu.memory_space<vmem>>, %arg6: memref<1x16xf32, #tpu.memory_space<vmem>>, %arg7: memref<8x16xf32, #tpu.memory_space<vmem>>) attributes {dimension_semantics = [], scalar_prefetch = 0 : i64, scratch_operands = 0 : i64, tpu.core_type = #tpu.core_type<tc>} {
    %c0 = arith.constant 0 : index
    %c0_0 = arith.constant 0 : index
    %0 = vector.load %arg0[%c0, %c0_0] : memref<8x32xf32, #tpu.memory_space<vmem>>, vector<8x32xf32>
    %1 = arith.truncf %0 : vector<8x32xf32> to vector<8x32xbf16>
    %c0_1 = arith.constant 0 : index
    %c0_2 = arith.constant 0 : index
    %2 = vector.load %arg1[%c0_1, %c0_2] : memref<32x128xbf16, #tpu.memory_space<vmem>>, vector<32x128xbf16>
    %cst = arith.constant dense<0.000000e+00> : vector<8x128xf32>
    %3 = tpu.matmul %1, %2, %cst {dimension_numbers = #tpu.dot_dimension_numbers<[1], [0], [0], [1], [0, 0, 1, 1], [], []>} : vector<8x32xbf16>, vector<32x128xbf16>, vector<8x128xf32> -> vector<8x128xf32>
    %c0_3 = arith.constant 0 : index
    %c0_4 = arith.constant 0 : index
    %4 = vector.load %arg2[%c0_3, %c0_4] : memref<1x128xf32, #tpu.memory_space<vmem>>, vector<1x128xf32>
    %5 = vector.broadcast %4 : vector<1x128xf32> to vector<8x128xf32>
    %6 = arith.addf %3, %5 : vector<8x128xf32>
    %7 = math.tanh %6 : vector<8x128xf32>
    %8 = arith.truncf %7 : vector<8x128xf32> to vector<8x128xbf16>
    %c0_5 = arith.constant 0 : index
    %c0_6 = arith.constant 0 : index
    %9 = vector.load %arg3[%c0_5, %c0_6] : memref<128x128xbf16, #tpu.memory_space<vmem>>, vector<128x128xbf16>
    %cst_7 = arith.constant dense<0.000000e+00> : vector<8x128xf32>
    %10 = tpu.matmul %8, %9, %cst_7 {dimension_numbers = #tpu.dot_dimension_numbers<[1], [0], [0], [1], [0, 0, 1, 1], [], []>} : vector<8x128xbf16>, vector<128x128xbf16>, vector<8x128xf32> -> vector<8x128xf32>
    %c0_8 = arith.constant 0 : index
    %c0_9 = arith.constant 0 : index
    %11 = vector.load %arg4[%c0_8, %c0_9] : memref<1x128xf32, #tpu.memory_space<vmem>>, vector<1x128xf32>
    %12 = vector.broadcast %11 : vector<1x128xf32> to vector<8x128xf32>
    %13 = arith.addf %10, %12 : vector<8x128xf32>
    %14 = math.tanh %13 : vector<8x128xf32>
    %15 = arith.truncf %14 : vector<8x128xf32> to vector<8x128xbf16>
    %c0_10 = arith.constant 0 : index
    %c0_11 = arith.constant 0 : index
    %16 = vector.load %arg5[%c0_10, %c0_11] : memref<128x16xbf16, #tpu.memory_space<vmem>>, vector<128x16xbf16>
    %cst_12 = arith.constant dense<0.000000e+00> : vector<8x16xf32>
    %17 = tpu.matmul %15, %16, %cst_12 {dimension_numbers = #tpu.dot_dimension_numbers<[1], [0], [0], [1], [0, 0, 1, 1], [], []>} : vector<8x128xbf16>, vector<128x16xbf16>, vector<8x16xf32> -> vector<8x16xf32>
    %c0_13 = arith.constant 0 : index
    %c0_14 = arith.constant 0 : index
    %18 = vector.load %arg6[%c0_13, %c0_14] : memref<1x16xf32, #tpu.memory_space<vmem>>, vector<1x16xf32>
    %19 = vector.broadcast %18 : vector<1x16xf32> to vector<8x16xf32>
    %20 = arith.addf %17, %19 : vector<8x16xf32>
    %c0_15 = arith.constant 0 : index
    %c0_16 = arith.constant 0 : index
    %21 = vector.load %arg7[%c0_15, %c0_16] : memref<8x16xf32, #tpu.memory_space<vmem>>, vector<8x16xf32>
    tpu.vector_store %arg7[%c0_15, %c0_16], %20 {strides = array<i32>} : memref<8x16xf32, #tpu.memory_space<vmem>>, vector<8x16xf32>,
    return
  }
}

</mosaic_0001>

<bundles_post_ra>
// kernel: tpu_custom_call.1
= control target key start
LH: loop header
LB: loop body
LE: loop exit
PB: predicated region body
PF: predicated region fallthrough
CT: control target
= control target key end

     0   :  { %12 = vsyncpa [#allocation3], 0  ;;  %s532_s0 = inlined_call_operand.vmem [shape: f32[8,32], index: 0, kind: input, shape index: {}]   ;;  %s533_s1 = inlined_call_operand.hbm [shape: bf16[32,128], index: 1, kind: input, shape index: {}]   ;;  %s534_s2 = inlined_call_operand.vmem [shape: f32[1,128], index: 2, kind: input, shape index: {}]   ;;  %s535_s3 = inlined_call_operand.vmem [shape: bf16[128,128], index: 3, kind: input, shape index: {}]   ;;  %s536_s4 = inlined_call_operand.vmem [shape: f32[1,128], index: 4, kind: input, shape index: {}]   ;;  %s537_s5 = inlined_call_operand.vmem [shape: bf16[128,16], index: 5, kind: input, shape index: {}]   ;;  %s538_s6 = inlined_call_operand.vmem [shape: f32[1,16], index: 6, kind: input, shape index: {}]   ;;  %s539_s7 = inlined_call_operand.hbm [shape: f32[8,16], index: 7, kind: output, shape index: {}]  }
   0x1   :  { %13 = vsyncpa [#allocation4], 0  ;;  %s20_s26 = sshll.u32 %s533_s1, 4  ;;  %s422_s27 = smov [#allocation2]   ;;  %s21_s26 = int_to_ptr.hbm [resolvable:$true] %s20_s26 }
   0x2   :  { %s22_s28 = sshll.u32 %s422_s27, 4  ;;  %s423_s29 = smov 64   ;;  %s23_s28 = int_to_ptr.vmem [resolvable:$true] %s22_s28 }
   0x3   :  { %s424_s30 = smov 4  }
   0x4   :  { %28 = dma.hbm_to_vmem [thread:$0]  %s21_s26, 256, %s23_s28, [#allocation3], %s423_s29, %s423_s29, %s424_s30  }
   0x5   :  { %418 = dma.done.wait [#allocation3], 256  }
   0x6   :  { %419 = vsyncadd [#allocation3], 4294967040  ;;  %v342_v0 = vld [vmem:[#allocation2 + $0x8] sm:$0xff]  ;;  %v350_v1 = vld [vmem:[%s535_s3 + $0x38] sm:$0xff]  ;;  %vm66_vm0 = vcmask 261120   ;;  %s425_s19 = smov [#allocation5]  }
   0x7   :  { %76 = vmatpush.bf16.msra.mxu0 %v342_v0  ;;  %v341_v2 = vld [vmem:[#allocation2] sm:$0xff]  ;;  %153 = vmatpush.bf16.msra.mxu1 %v350_v1  ;;  %v349_v4 = vld [vmem:[%s535_s3 + $0x30] sm:$0xff]  ;;  %v348_v6 = vld [vmem:[%s535_s3 + $0x28] sm:$0xff]  ;;  %s256_s20 = sshll.u32 %s425_s19, 4  ;;  %s258_s22 = sshll.u32 %s539_s7, 4  ;;  %vm249_vm1 = vcmask 130048   ;;  %s257_s20 = int_to_ptr.vmem [resolvable:$true] %s256_s20  ;;  %s259_s22 = int_to_ptr.hbm [resolvable:$true] %s258_s22 }
   0x8   :  { %v44_v3 = vld [vmem:[%s532_s0] sm:$0xff]  ;;  %v346_v8 = vld [vmem:[%s535_s3 + $0x18] sm:$0xff]  ;;  %v345_v9 = vld [vmem:[%s535_s3 + $0x10] sm:$0xff] }
   0x9   :  { %v45_v5 = vpack.c.bf16 %v44_v3, %v44_v3  ;;  %v347_v7 = vld [vmem:[%s535_s3 + $0x20] sm:$0xff]  ;;  %v344_v10 = vld [vmem:[%s535_s3 + $0x8] sm:$0xff]  ;;  %v358_v12 = vld [vmem:[%s537_s5 + $0x38] sm:$0xff] }
   0xa   :  { %v343_v11 = vld [vmem:[%s535_s3] sm:$0xff]  ;;  %236 = vmatpush.bf16.msra.mxu2 %v358_v12  ;;  %v357_v13 = vld [vmem:[%s537_s5 + $0x30] sm:$0xff]  ;;  %v356_v14 = vld [vmem:[%s537_s5 + $0x28] sm:$0xff] }
   0xb   :  { %77 = vmatpush.bf16.msra.mxu0 %v341_v2  ;;  %154 = vmatpush.bf16.msra.mxu1 %v349_v4  ;;  %v355_v15 = vld [vmem:[%s537_s5 + $0x20] sm:$0xff]  ;;  %v354_v16 = vld [vmem:[%s537_s5 + $0x18] sm:$0xff]  ;;  %v353_v23 = vld [vmem:[%s537_s5 + $0x10] sm:$0xff] }
   0xc   :  { %v363_v17 = vld [vmem:[%s534_s2] ss:$0 sm:$0xff]  ;;  %v352_v24 = vld [vmem:[%s537_s5 + $0x8] sm:$0xff] }
   0xd   :  { %v351_v25 = vld [vmem:[%s537_s5] sm:$0xff] }
   0xe   :  { %276 = vmatmul.msk.bf16.vlgmr.msra.gmra.mxu0 %vm66_vm0, %v45_v5  ;;  %237 = vmatpush.bf16.msra.mxu2 %v357_v13  ;;  %v364_v26 = vld [vmem:[%s536_s4] ss:$0 sm:$0xff] }
   0xf   :  { %155 = vmatpush.bf16.msra.mxu1 %v348_v6  ;;  %v365_v32 = vld [vmem:[%s538_s6] ss:$0 sm:$0xff] }
  0x12   :  { %238 = vmatpush.bf16.msra.mxu2 %v356_v14 }
  0x13   :  { %156 = vmatpush.bf16.msra.mxu1 %v347_v7 }
  0x16   :  { %239 = vmatpush.bf16.msra.mxu2 %v355_v15 }
  0x17   :  { %157 = vmatpush.bf16.msra.mxu1 %v346_v8 }
  0x1a   :  { %240 = vmatpush.bf16.msra.mxu2 %v354_v16 }
  0x1b   :  { %158 = vmatpush.bf16.msra.mxu1 %v345_v9 }
  0x1e   :  { %241 = vmatpush.bf16.msra.mxu2 %v353_v23 }
  0x1f   :  { %159 = vmatpush.bf16.msra.mxu1 %v344_v10 }
  0x22   :  { %242 = vmatpush.bf16.msra.mxu2 %v352_v24 }
  0x23   :  { %160 = vmatpush.bf16.msra.mxu1 %v343_v11 }
  0x26   :  { %243 = vmatpush.bf16.msra.mxu2 %v351_v25 }
  0x8b   :  { %v79_v18 = vpop.f32.mrf.mxu0 }
  0x8c   :  { %v80_v19 = vadd.f32 %v363_v17, %v79_v18 }
  0x8e   :  { %366 = vtanh.f32 %v80_v19 }
  0x93   :  { %v81_v20 = vpop.f32.mrf.mxu0 }
  0x94   :  { %v367_v21 = vpop.eup %366 }
  0x95   :  { %v84_v22 = vpack.c.bf16 %v367_v21, %v367_v21 }
  0x97   :  { %161 = vmatmul.bf16.vlgmr.msra.gmra.mxu1 %v84_v22 }
 0x114   :  { %v162_v27 = vpop.f32.mrf.mxu1 }
 0x115   :  { %v163_v28 = vadd.f32 %v364_v26, %v162_v27 }
 0x117   :  { %368 = vtanh.f32 %v163_v28 }
 0x11c   :  { %v164_v29 = vpop.f32.mrf.mxu1 }
 0x11d   :  { %v369_v30 = vpop.eup %368 }
 0x11e   :  { %v167_v31 = vpack.c.bf16 %v369_v30, %v369_v30 }
 0x120   :  { %244 = vmatmul.bf16.vlgmr.msra.gmra.mxu2 %v167_v31 }
 0x1a3   :  { %v245_v33 = vpop.f32.mrf.mxu2 }
 0x1a4   :  { %v246_v34 = vadd.f32 %v365_v32, %v245_v33 }
 0x1a6   :  { %250 = vst.msk [vmem:[#allocation5] sm:$0xff] %vm249_vm1, %v246_v34 }
 0x1a7   :  { %261 = dma.vmem_to_hbm [thread:$0]  %s257_s20, 128, %s259_s22, [#allocation4]  }
 0x1ab   :  { %v247_v35 = vpop.f32.mrf.mxu2 }
 0x1ac   :  { %420 = dma.done.wait [#allocation4], 128  }
 0x1ad   :  { %421 = vsyncadd [#allocation4], 4294967168 }
 0x1ae   :  { %266 = vsyncpa [#allocation3], 1 }
 0x1af   :  { %267 = vsyncpa [#allocation4], 1 }

</bundles_post_ra>
